<compile_context>
chip_gen: v6e
topology: v6e:2x2x1
jax: 0.10.0
libtpu: 0.0.40
codegen_flags: <defaults>
</compile_context>

<pallas_src>
import functools

import jax
import jax.numpy as jnp
from jax.experimental import pallas as pl
from jax.experimental.pallas import tpu as pltpu


def make_divisible(v, divisor=8, min_value=None):
    # Same helper OpenELM uses to size the intermediate dim.
    if min_value is None:
        min_value = divisor
    new_v = max(min_value, int(v + divisor / 2) // divisor * divisor)
    if new_v < 0.9 * v:
        new_v += divisor
    return new_v


# -----------------------------------------------------------------------------
# Kernels
# -----------------------------------------------------------------------------
def _ffn_glu_resident_kernel(x_ref, w1g_ref, w1v_ref, w2_ref, o_ref):
    """Weights fully VMEM-resident (constant index maps); grid = (token tiles,)."""
    x = x_ref[...]
    g = jnp.dot(x, w1g_ref[...], preferred_element_type=jnp.float32)
    v = jnp.dot(x, w1v_ref[...], preferred_element_type=jnp.float32)
    h = (g * jax.nn.sigmoid(g)) * v                       # SiLU(gate) * value
    o_ref[...] = jnp.dot(h.astype(w2_ref.dtype), w2_ref[...],
                         preferred_element_type=jnp.float32).astype(o_ref.dtype)


def _ffn_glu_stream_kernel(x_ref, w1g_ref, w1v_ref, w2_ref, o_ref, acc_ref):
    """Intermediate dim I is a reduction grid axis (last); f32 VMEM accumulator."""
    k = pl.program_id(1)

    @pl.when(k == 0)
    def _():
        acc_ref[...] = jnp.zeros_like(acc_ref)

    x = x_ref[...]
    g = jnp.dot(x, w1g_ref[...], preferred_element_type=jnp.float32)
    v = jnp.dot(x, w1v_ref[...], preferred_element_type=jnp.float32)
    h = (g * jax.nn.sigmoid(g)) * v
    acc_ref[...] += jnp.dot(h.astype(w2_ref.dtype), w2_ref[...],
                            preferred_element_type=jnp.float32)

    @pl.when(k == pl.num_programs(1) - 1)
    def _():
        o_ref[...] = acc_ref[...].astype(o_ref.dtype)


# -----------------------------------------------------------------------------
# Wrapper
# -----------------------------------------------------------------------------
_VMEM_CAP_CACHE = []


def _vmem_capacity_bytes():
    """Per-core VMEM capacity; conservative 64 MiB (v7x) fallback."""
    if _VMEM_CAP_CACHE:
        return _VMEM_CAP_CACHE[0]
    cap = 64 * 1024 * 1024
    try:
        info = pltpu.get_tpu_info()
        got = getattr(info, "vmem_capacity_bytes", None)
        if got:
            cap = int(got)
    except Exception:
        pass
    _VMEM_CAP_CACHE.append(cap)
    return cap


@functools.partial(jax.jit,
                   static_argnames=("tm", "ti", "compute_dtype", "weights_resident"))
def openelm_ffn_glu(x, w1_gate, w1_val, w2, *, tm=None, ti=None,
                    compute_dtype=None, weights_resident=None):
    """OpenELM SwiGLU FFN.  x: [B, S, D] -> [B, S, D].

    w1_gate, w1_val: [D, I]  gate/value halves of proj_1 (stored [in, out]).
    w2:              [I, D]  proj_2 (stored [in, out]).
    compute_dtype:   optional operand dtype inside the kernel (e.g. jnp.bfloat16,
                     the intended v6e/v7x operating point); accumulation is always
                     f32 and the output keeps x.dtype.
    weights_resident: None = auto (VMEM-fit check); True/False = force a path.
    """
    B, S, D = x.shape
    I = w1_gate.shape[1]
    M = B * S
    out_dtype = x.dtype

    cdt = compute_dtype if compute_dtype is not None else x.dtype
    if x.dtype != cdt:
        x = x.astype(cdt)
    if w1_gate.dtype != cdt:
        w1_gate = w1_gate.astype(cdt)
        w1_val = w1_val.astype(cdt)
        w2 = w2.astype(cdt)
    itemsize = jnp.dtype(cdt).itemsize

    vmem_cap = _vmem_capacity_bytes()
    budget = int(0.70 * vmem_cap)          # headroom for compiler scratch etc.

    # ---- token tile -----------------------------------------------------------
    tm_req = 512 if tm is None else tm      # big tile amortizes weight traffic
    tm_eff = min(tm_req, max(8, ((M + 7) // 8) * 8))

    # ---- resident-weights fit check (conservative: weights counted x2) --------
    resident_need = (2 * 3 * D * I * itemsize            # W1g + W1v + W2 (x2 safety)
                     + 2 * 2 * tm_eff * D * itemsize     # x + out, double-buffered
                     + tm_eff * D * 4                    # f32 result tile
                     + 3 * tm_eff * I * 4)               # f32 g/v/h intermediates
    if weights_resident is None:
        use_resident = resident_need <= budget
    else:
        use_resident = bool(weights_resident)

    ti_req = 256 if ti is None else ti       # 256-aligned for v6e/v7x MXU (128 ok on v5e)

    def _stream_tiles(tm_e, ti_e):
        ti_e = min(ti_e, I)
        Ip = I
        need = 0
        for _ in range(32):
            if ti_e >= I:
                ti_e, Ip = I, I
            else:
                ti_e = max(128, (ti_e // 128) * 128)
                Ip = -(-I // ti_e) * ti_e
            need = ((2 * 2 * tm_e * D + 2 * (2 * D * ti_e + ti_e * D)) * itemsize
                    + tm_e * D * 4 + 3 * tm_e * ti_e * 4)
            if need <= budget or (tm_e <= 64 and ti_e <= 128):
                break
            if ti_e > 128:                    # shrink weight blocks first (VMEM-lean)
                ti_e //= 2
            else:
                tm_e = max(64, ((tm_e // 2) // 8) * 8)
        return tm_e, ti_e, Ip, need

    flops = int(6 * M * D * I)               # 2*M*D*I (gate) + 2*M*D*I (value) + 2*M*I*D
    transcendentals = int(M * I)             # sigmoid

    if use_resident:
        tm_run = tm_eff
        Mp = -(-M // tm_run) * tm_run
        x2d = x.reshape(M, D)
        if Mp != M:
            x2d = jnp.pad(x2d, ((0, Mp - M), (0, 0)))

        grid_spec = pltpu.PrefetchScalarGridSpec(
            num_scalar_prefetch=0,
            grid=(Mp // tm_run,),
            in_specs=[
                pl.BlockSpec((tm_run, D), lambda i: (i, 0)),   # x tile
                pl.BlockSpec((D, I), lambda i: (0, 0)),        # gate weight (resident)
                pl.BlockSpec((D, I), lambda i: (0, 0)),        # value weight (resident)
                pl.BlockSpec((I, D), lambda i: (0, 0)),        # proj_2 (resident)
            ],
            out_specs=pl.BlockSpec((tm_run, D), lambda i: (i, 0)),
        )
        kernel = _ffn_glu_resident_kernel
        dims = ("parallel",)
        need = resident_need
        bytes_accessed = int((2 * M * D + 3 * D * I) * itemsize)
        args = (x2d, w1_gate, w1_val, w2)
    else:
        tm_run, ti_e, Ip, need = _stream_tiles(tm_eff, ti_req)
        w1g, w1v, w2p = w1_gate, w1_val, w2
        if Ip != I:   # zero-pad I (exact: padded SwiGLU columns contribute 0)
            w1g = jnp.pad(w1g, ((0, 0), (0, Ip - I)))
            w1v = jnp.pad(w1v, ((0, 0), (0, Ip - I)))
            w2p = jnp.pad(w2p, ((0, Ip - I), (0, 0)))

        Mp = -(-M // tm_run) * tm_run
        x2d = x.reshape(M, D)
        if Mp != M:
            x2d = jnp.pad(x2d, ((0, Mp - M), (0, 0)))

        grid_spec = pltpu.PrefetchScalarGridSpec(
            num_scalar_prefetch=0,
            grid=(Mp // tm_run, Ip // ti_e),
            in_specs=[
                pl.BlockSpec((tm_run, D), lambda i, k: (i, 0)),   # x tile (const over k)
                pl.BlockSpec((D, ti_e), lambda i, k: (0, k)),     # gate weight k-block
                pl.BlockSpec((D, ti_e), lambda i, k: (0, k)),     # value weight k-block
                pl.BlockSpec((ti_e, D), lambda i, k: (k, 0)),     # proj_2 k-block
            ],
            out_specs=pl.BlockSpec((tm_run, D), lambda i, k: (i, 0)),
            scratch_shapes=[pltpu.VMEM((tm_run, D), jnp.float32)],
        )
        kernel = _ffn_glu_stream_kernel
        dims = ("parallel", "arbitrary")
        bytes_accessed = int(2 * M * D * itemsize
                             + (Mp // tm_run) * 3 * D * Ip * itemsize)
        args = (x2d, w1g, w1v, w2p)

    vmem_limit = int(min(int(0.85 * vmem_cap),
                         max(int(1.25 * need), 32 * 1024 * 1024)))

    cost = pl.CostEstimate(flops=flops, transcendentals=transcendentals,
                           bytes_accessed=bytes_accessed)

    out2d = pl.pallas_call(
        kernel,
        out_shape=jax.ShapeDtypeStruct((Mp, D), out_dtype),
        grid_spec=grid_spec,
        compiler_params=pltpu.CompilerParams(
            dimension_semantics=dims,
            vmem_limit_bytes=vmem_limit,
        ),
        cost_estimate=cost,
    )(*args)

    return out2d[:M].reshape(B, S, D)


# -----------------------------------------------------------------------------
# Reference & test harness
# -----------------------------------------------------------------------------
def reference_ffn_glu(x, w1_gate, w1_val, w2):
    """Pure-JAX reference mirroring the PyTorch forward (GLU branch)."""
    hp = jax.lax.Precision.HIGHEST
    y1 = jnp.einsum("bsd,di->bsi", x, w1_gate, precision=hp)
    y2 = jnp.einsum("bsd,di->bsi", x, w1_val, precision=hp)
    y = jax.nn.silu(y1) * y2
    return jnp.einsum("bsi,id->bsd", y, w2, precision=hp)


def _make_case(key, batch, seq, model_dim, ffn_multiplier, ffn_dim_divisor):
    intermediate_dim = int(make_divisible(ffn_multiplier * model_dim,
                                          divisor=ffn_dim_divisor))
    kx, k1, k2 = jax.random.split(key, 3)
    x = jax.random.normal(kx, (batch, seq, model_dim), dtype=jnp.float32)

    # PyTorch: proj_1.weight is [2*I, D]; y_12 = x @ W1^T; chunk along last dim.
    # Equivalent here: two [D, I] matrices (gate, value), stored [in, out].
    w1_full = jax.random.normal(k1, (2 * intermediate_dim, model_dim),
                                dtype=jnp.float32) * 0.05
    w1_gate = w1_full[:intermediate_dim, :].T           # [D, I]
    w1_val = w1_full[intermediate_dim:, :].T            # [D, I]

    # PyTorch: proj_2.weight is [D, I]; out = y @ W2^T -> stored here as [I, D].
    w2_full = jax.random.normal(k2, (model_dim, intermediate_dim),
                                dtype=jnp.float32) * 0.05
    w2 = w2_full.T                                       # [I, D]
    return x, w1_gate, w1_val, w2


if __name__ == "__main__":
    key = jax.random.PRNGKey(0)
    k_small, k_big = jax.random.split(key)

    # Case 1: tiny config (model_dim=32, ffn_multiplier=2.0, divisor=16 -> I=64);
    # exercises the weights-resident fast path, single token tile.
    x, w1g, w1v, w2 = _make_case(k_small, batch=2, seq=8, model_dim=32,
                                 ffn_multiplier=2.0, ffn_dim_divisor=16)
    out = jax.block_until_ready(openelm_ffn_glu(x, w1g, w1v, w2))
    ref = reference_ffn_glu(x, w1g, w1v, w2)
    assert out.shape == x.shape
    assert jnp.allclose(out, ref, atol=2e-4, rtol=2e-4), "mismatch (resident path)"

    # Case 2: model_dim=128, ffn_multiplier=4.0, divisor=128 -> I=512; force the
    # streaming/accumulator path with ti=256 (nk=2) to test the I-reduction.
    x, w1g, w1v, w2 = _make_case(k_big, batch=2, seq=64, model_dim=128,
                                 ffn_multiplier=4.0, ffn_dim_divisor=128)
    out = jax.block_until_ready(
        openelm_ffn_glu(x, w1g, w1v, w2, ti=256, weights_resident=False))
    ref = reference_ffn_glu(x, w1g, w1v, w2)
    assert out.shape == x.shape
    assert jnp.allclose(out, ref, atol=2e-4, rtol=2e-4), "mismatch (streaming path)"

    # Case 3: bf16 operands (intended v6e/v7x operating point), f32 accumulation.
    out_bf16 = jax.block_until_ready(
        openelm_ffn_glu(x, w1g, w1v, w2, compute_dtype=jnp.bfloat16))
    assert out_bf16.shape == x.shape
    assert bool(jnp.all(jnp.isfinite(out_bf16)))
    assert jnp.allclose(out_bf16, ref, atol=1e-1, rtol=1e-1), "mismatch (bf16 path)"

    print("KERNEL_OK")
</pallas_src>

<mosaic_0001>
module attributes {stable_mosaic.version = 11 : i64} {
  func.func @_ffn_glu_resident_kernel(%arg0: i32, %arg1: memref<16x32xf32, #tpu.memory_space<vmem>>, %arg2: memref<32x64xf32, #tpu.memory_space<vmem>>, %arg3: memref<32x64xf32, #tpu.memory_space<vmem>>, %arg4: memref<64x32xf32, #tpu.memory_space<vmem>>, %arg5: memref<16x32xf32, #tpu.memory_space<vmem>>) attributes {dimension_semantics = [#tpu.dimension_semantics<parallel>], iteration_bounds = array<i64: 1>, scalar_prefetch = 0 : i64, scratch_operands = 0 : i64, tpu.core_type = #tpu.core_type<tc>, window_params = [{transform_indices = @transform_0, window_bounds = array<i64: 16, 32>}, {pipeline_mode = #tpu.pipeline_mode<synchronous>, transform_indices = @transform_1, window_bounds = array<i64: 32, 64>}, {pipeline_mode = #tpu.pipeline_mode<synchronous>, transform_indices = @transform_2, window_bounds = array<i64: 32, 64>}, {pipeline_mode = #tpu.pipeline_mode<synchronous>, transform_indices = @transform_3, window_bounds = array<i64: 64, 32>}, {transform_indices = @transform_4, window_bounds = array<i64: 16, 32>}]} {
    %c0 = arith.constant 0 : index
    %c0_0 = arith.constant 0 : index
    %0 = vector.load %arg1[%c0, %c0_0] : memref<16x32xf32, #tpu.memory_space<vmem>>, vector<16x32xf32>
    %c0_1 = arith.constant 0 : index
    %c0_2 = arith.constant 0 : index
    %1 = vector.load %arg2[%c0_1, %c0_2] : memref<32x64xf32, #tpu.memory_space<vmem>>, vector<32x64xf32>
    %cst = arith.constant dense<0.000000e+00> : vector<16x64xf32>
    %2 = tpu.matmul %0, %1, %cst {dimension_numbers = #tpu.dot_dimension_numbers<[1], [0], [0], [1], [0, 0, 1, 1], [], []>} : vector<16x32xf32>, vector<32x64xf32>, vector<16x64xf32> -> vector<16x64xf32>
    %c0_3 = arith.constant 0 : index
    %c0_4 = arith.constant 0 : index
    %3 = vector.load %arg3[%c0_3, %c0_4] : memref<32x64xf32, #tpu.memory_space<vmem>>, vector<32x64xf32>
    %cst_5 = arith.constant dense<0.000000e+00> : vector<16x64xf32>
    %4 = tpu.matmul %0, %3, %cst_5 {dimension_numbers = #tpu.dot_dimension_numbers<[1], [0], [0], [1], [0, 0, 1, 1], [], []>} : vector<16x32xf32>, vector<32x64xf32>, vector<16x64xf32> -> vector<16x64xf32>
    %5 = arith.negf %2 : vector<16x64xf32>
    %6 = math.exp %5 : vector<16x64xf32>
    %cst_6 = arith.constant 1.000000e+00 : f32
    %7 = vector.broadcast %cst_6 : f32 to vector<16x64xf32>
    %8 = arith.addf %7, %6 : vector<16x64xf32>
    %9 = arith.divf %7, %8 : vector<16x64xf32>
    %10 = arith.mulf %2, %9 : vector<16x64xf32>
    %11 = arith.mulf %10, %4 : vector<16x64xf32>
    %c0_7 = arith.constant 0 : index
    %c0_8 = arith.constant 0 : index
    %12 = vector.load %arg4[%c0_7, %c0_8] : memref<64x32xf32, #tpu.memory_space<vmem>>, vector<64x32xf32>
    %cst_9 = arith.constant dense<0.000000e+00> : vector<16x32xf32>
    %13 = tpu.matmul %11, %12, %cst_9 {dimension_numbers = #tpu.dot_dimension_numbers<[1], [0], [0], [1], [0, 0, 1, 1], [], []>} : vector<16x64xf32>, vector<64x32xf32>, vector<16x32xf32> -> vector<16x32xf32>
    %c0_10 = arith.constant 0 : index
    %c0_11 = arith.constant 0 : index
    %14 = vector.load %arg5[%c0_10, %c0_11] : memref<16x32xf32, #tpu.memory_space<vmem>>, vector<16x32xf32>
    tpu.vector_store %arg5[%c0_10, %c0_11], %13 {strides = array<i32>} : memref<16x32xf32, #tpu.memory_space<vmem>>, vector<16x32xf32>,
    return
  }
  func.func @transform_0(%arg0: i32) -> (i32, i32) {
    %c0_i32 = arith.constant 0 : i32
    %c0_i32_0 = arith.constant 0 : i32
    return %arg0, %c0_i32 : i32, i32
  }
  func.func @transform_1(%arg0: i32) -> (i32, i32) {
    %c0_i32 = arith.constant 0 : i32
    %c0_i32_0 = arith.constant 0 : i32
    %c0_i32_1 = arith.constant 0 : i32
    return %c0_i32, %c0_i32_0 : i32, i32
  }
  func.func @transform_2(%arg0: i32) -> (i32, i32) {
    %c0_i32 = arith.constant 0 : i32
    %c0_i32_0 = arith.constant 0 : i32
    %c0_i32_1 = arith.constant 0 : i32
    return %c0_i32, %c0_i32_0 : i32, i32
  }
  func.func @transform_3(%arg0: i32) -> (i32, i32) {
    %c0_i32 = arith.constant 0 : i32
    %c0_i32_0 = arith.constant 0 : i32
    %c0_i32_1 = arith.constant 0 : i32
    return %c0_i32, %c0_i32_0 : i32, i32
  }
  func.func @transform_4(%arg0: i32) -> (i32, i32) {
    %c0_i32 = arith.constant 0 : i32
    %c0_i32_0 = arith.constant 0 : i32
    return %arg0, %c0_i32 : i32, i32
  }
}

</mosaic_0001>

<bundles_post_ra>
// kernel: openelm_ffn_glu.1
= control target key start
LH: loop header
LB: loop body
LE: loop exit
PB: predicated region body
PF: predicated region fallthrough
CT: control target
= control target key end

     0   :  { %vm24_vm0 = vcmask 261120   ;;  %s504_s0 = inlined_call_operand.vmem [shape: f32[16,32], index: 0, kind: input, shape index: {}]   ;;  %s505_s1 = inlined_call_operand.vmem [shape: f32[32,64], index: 1, kind: input, shape index: {}]   ;;  %s506_s2 = inlined_call_operand.vmem [shape: f32[32,64], index: 2, kind: input, shape index: {}]   ;;  %s507_s3 = inlined_call_operand.vmem [shape: f32[64,32], index: 3, kind: input, shape index: {}]   ;;  %s508_s4 = inlined_call_operand.hbm [shape: f32[16,32], index: 4, kind: output, shape index: {}]  }
   0x1   :  { %v23_v0 = vld [vmem:[%s505_s1 + $0x18] sm:$0xff]  ;;  %v22_v1 = vld [vmem:[%s505_s1 + $0x10] sm:$0xff]  ;;  %v18_v2 = vld [vmem:[%s504_s0] sm:$0xff] }
   0x2   :  { %339 = vmatprep.subr.mxu1 %v23_v0  ;;  %v21_v3 = vld [vmem:[%s505_s1 + $0x8] sm:$0xff]  ;;  %347 = vmatprep.mubr.msk.f32.mxu1 %vm24_vm0, %v18_v2 }
   0x3   :  { %340 = vmatpush3.msra.mxu1 %v23_v0 }
   0x4   :  { %341 = vmatprep.subr.mxu1 %v22_v1 }
   0x5   :  { %9 = vsyncpa [#allocation3], 0  ;;  %342 = vmatpush3.msra.mxu1 %v22_v1  ;;  %v20_v4 = vld [vmem:[%s505_s1] sm:$0xff]  ;;  %v19_v5 = vld [vmem:[%s504_s0 + $0x8] sm:$0xff]  ;;  %vm209_vm1 = vcmask 523264  }
   0x6   :  { %343 = vmatprep.subr.mxu1 %v21_v3  ;;  %v109_v6 = vld [vmem:[%s506_s2 + $0x18] sm:$0xff]  ;;  %v108_v7 = vld [vmem:[%s506_s2 + $0x10] sm:$0xff]  ;;  %v107_v8 = vld [vmem:[%s506_s2 + $0x8] sm:$0xff] }
   0x7   :  { %344 = vmatpush3.msra.mxu1 %v21_v3  ;;  %v106_v9 = vld [vmem:[%s506_s2] sm:$0xff]  ;;  %v208_v10 = vld [vmem:[%s507_s3 + $0x38] sm:$0xff]  ;;  %v207_v11 = vld [vmem:[%s507_s3 + $0x30] sm:$0xff] }
   0x8   :  { %345 = vmatprep.subr.mxu1 %v20_v4  ;;  %361 = vmatprep.subr.mxu0 %v208_v10  ;;  %v206_v12 = vld [vmem:[%s507_s3 + $0x28] sm:$0xff]  ;;  %v205_v13 = vld [vmem:[%s507_s3 + $0x20] sm:$0xff]  ;;  %v204_v14 = vld [vmem:[%s507_s3 + $0x18] sm:$0xff] }
   0x9   :  { %346 = vmatpush3.msra.mxu1 %v20_v4  ;;  %362 = vmatpush3.msra.mxu0 %v208_v10  ;;  %v203_v15 = vld [vmem:[%s507_s3 + $0x10] sm:$0xff]  ;;  %v202_v16 = vld [vmem:[%s507_s3 + $0x8] sm:$0xff]  ;;  %v201_v17 = vld [vmem:[%s507_s3] sm:$0xff]  ;;  %s413_s3 = smov [#allocation2]  }
   0xa   :  { %348 = vmatmul.mubr.msk.f32.vlgmr.msra.gmra.mxu1 %vm24_vm0, %v19_v5  ;;  %350 = vmatprep.subr.mxu1 %v109_v6  ;;  %s298_s22 = sshll.u32 %s413_s3, 4  ;;  %s299_s22 = int_to_ptr.vmem [resolvable:$true] %s298_s22 }
   0xb   :  { %351 = vmatpush3.msra.mxu1 %v109_v6  ;;  %358 = vmatprep.mubr.msk.f32.mxu1 %vm24_vm0, %v18_v2  ;;  %s391_s23 = scalar_lea.vmem %s299_s22, 256  ;;  %p396_p1 = scmp.lt.s32.totalorder %s299_s22, %s299_s22 }
   0xc   :  { %352 = vmatprep.subr.mxu1 %v108_v7  ;;  %363 = vmatprep.subr.mxu0 %v207_v11  ;;  %p392_p0 = scmp.ne.s32.totalorder %s299_s22, %s391_s23  ;;  %p397_p2 = scmp.lt.s32.totalorder %s391_s23, %s391_s23 }
   0xd   :  { %353 = vmatpush3.msra.mxu1 %v108_v7  ;;  %364 = vmatpush3.msra.mxu0 %v207_v11 }
   0xe   :  { %354 = vmatprep.subr.mxu1 %v107_v8  ;;  %365 = vmatprep.subr.mxu0 %v206_v12  ;;  %p398_p3 = por %p397_p2, %p396_p1 }
   0xf   :  { %355 = vmatpush3.msra.mxu1 %v107_v8  ;;  %366 = vmatpush3.msra.mxu0 %v206_v12 }
  0x10   :  { %356 = vmatprep.subr.mxu1 %v106_v9  ;;  %367 = vmatprep.subr.mxu0 %v205_v13  ;;  %p399_p4 = pnand %p398_p3, %p392_p0 }
  0x11   :  { %357 = vmatpush3.msra.mxu1 %v106_v9  ;;  %368 = vmatpush3.msra.mxu0 %v205_v13 }
  0x12   :  { %359 = vmatmul.mubr.msk.f32.vlgmr.msra.gmra.mxu1 %vm24_vm0, %v19_v5  ;;  %369 = vmatprep.subr.mxu0 %v204_v14 }
  0x13   :  { %370 = vmatpush3.msra.mxu0 %v204_v14 }
  0x14   :  { %371 = vmatprep.subr.mxu0 %v203_v15 }
  0x15   :  { %372 = vmatpush3.msra.mxu0 %v203_v15 }
  0x16   :  { %373 = vmatprep.subr.mxu0 %v202_v16 }
  0x17   :  { %374 = vmatpush3.msra.mxu0 %v202_v16 }
  0x18   :  { %375 = vmatprep.subr.mxu0 %v201_v17 }
  0x19   :  { %376 = vmatpush3.msra.mxu0 %v201_v17 }
  0xca   :  { %v349_v18 = vpop.f32.mrf.mxu1 }
  0xcb   :  { %v314_v19 = vmul.f32 -1.442695, %v349_v18 }
  0xcc   :  { %v97_v20 = vpop.f32.mrf.mxu1 }
  0xcd   :  { %383 = vpow2.f32 %v314_v19  ;;  %v313_v21 = vmul.f32 -1.442695, %v97_v20 }
  0xcf   :  { %385 = vpow2.f32 %v313_v21 }
  0xd2   :  { %v360_v27 = vpop.f32.mrf.mxu1 }
  0xd4   :  { %v176_v31 = vpop.f32.mrf.mxu1 }
  0xda   :  { %v384_v22 = vpop.eup %383 }
  0xdb   :  { %v192_v23 = vadd.f32 1.0, %v384_v22 }
  0xdc   :  { %v386_v24 = vpop.eup %385 }
  0xdd   :  { %387 = vrcp.f32 %v192_v23  ;;  %v191_v25 = vadd.f32 1.0, %v386_v24 }
  0xdf   :  { %389 = vrcp.f32 %v191_v25 }
  0xea   :  { %v388_v26 = vpop.eup %387 }
  0xeb   :  { %v198_v29 = vmul.f32 %v388_v26, %v349_v18 }
  0xec   :  { %v390_v28 = vpop.eup %389 }
  0xed   :  { %v197_v30 = vmul.f32 %v390_v28, %v97_v20  ;;  %v200_v33 = vmul.f32 %v360_v27, %v198_v29 }
  0xef   :  { %v199_v32 = vmul.f32 %v197_v30, %v176_v31 }
  0xf1   :  { %377 = vmatprep.mubr.msk.f32.mxu0 %vm209_vm1, %v199_v32 }
  0xf2   :  { %378 = vmatmul.mubr.msk.f32.vlgmr.msra.gmra.mxu0 %vm209_vm1, %v200_v33 }
 0x1b2   :  { %v379_v34 = vpop.f32.mrf.mxu0 }
 0x1b3   :  { %292 = vst.msk [vmem:[#allocation2 + $0x8] sm:$0xff] %vm24_vm0, %v379_v34 }
 0x1b4   :  { %v282_v35 = vpop.f32.mrf.mxu0 }
 0x1b5   :  { %291 = vst.msk [vmem:[#allocation2] sm:$0xff] %vm24_vm0, %v282_v35 }
 0x1b6   :  { %402 = shalt.err (!%p399_p4)
}
 0x1b7   :  { %s414_s24 = smov 128   ;;  %s415_s25 = smov 8  }
 0x1b8   :  { %304 = dma.vmem_to_hbm [thread:$0]  %s299_s22, 256, %s508_s4, [#allocation3], %s414_s24, %s414_s24, %s415_s25  }
 0x1b9   :  { %411 = dma.done.wait [#allocation3], 256  }
 0x1ba   :  { %412 = vsyncadd [#allocation3], 4294967040 }
 0x1bb   :  { %308 = vsyncpa [#allocation3], 1 }

</bundles_post_ra>
